<compile_context>
chip_gen: v7x
topology: tpu7x:2x2x1
jax: 0.10.0
libtpu: 0.0.40
codegen_flags: <defaults>
</compile_context>

<pallas_src>
import numpy as np
import jax
import jax.numpy as jnp
from jax.experimental import pallas as pl
from jax.experimental.pallas import tpu as pltpu


def _round_up(x, m):
    return ((x + m - 1) // m) * m


# ---------------------------------------------------------------------------
# Kernel: B_blk x [(Cout, Cin) @ (Cin, T)] + bias per grid step.
# ---------------------------------------------------------------------------
def _conv1x1_kernel(x_ref, w_ref, b_ref, o_ref):
    # x_ref: (B_blk, Cin, T)  w_ref: (Cout, Cin)  b_ref: (Cout, 1)  o_ref: (B_blk, Cout, T)
    w = w_ref[...]
    bias = b_ref[...]
    for i in range(x_ref.shape[0]):            # static unroll over the batch block
        y = jnp.dot(w, x_ref[i],
                    preferred_element_type=jnp.float32,
                    precision=jax.lax.Precision.HIGHEST)
        o_ref[i] = (y + bias).astype(o_ref.dtype)


# ---------------------------------------------------------------------------
# Tile selection.
# ---------------------------------------------------------------------------
_MAX_B_BLK = 16            # cap on per-step batch block (bounds the static unroll)


def _vmem_budget_bytes():
    """Combined (input + output) bytes allowed per grid step (generation-aware)."""
    try:
        cap = int(pltpu.get_tpu_info().vmem_capacity_bytes)
    except Exception:
        cap = 64 << 20     # assume the smallest generation (v7x per-TC VMEM)
    return max(2 << 20, min(8 << 20, cap // 8))


def _pick_tiles(N, hw, cin, cout, dtype_bytes, budget):
    """Returns (b_blk, t): batch images per step and spatial (lane) tile."""
    per_pixel = (cin + cout) * dtype_bytes
    max_t = max(128, budget // per_pixel)

    if hw <= max_t:
        # Whole image fits in one block: amortize per-step overhead over
        # several batch images per grid step.
        t = hw
        per_image = per_pixel * max(hw, 1)
        b_blk = int(max(1, min(N, _MAX_B_BLK, budget // max(per_image, 1))))
    else:
        # Largest lane-dense multiple of 128 under budget; partial edge blocks
        # along hw are masked by Pallas, so no divisibility requirement.
        t = max(128, (max_t // 128) * 128)
        b_blk = 1

    # Guarantee >= 2 grid steps on a parallel axis (v7x has 2 TensorCores).
    if pl.cdiv(N, b_blk) * pl.cdiv(hw, t) < 2:
        if N >= 2:
            b_blk = max(1, pl.cdiv(N, 2))                 # -> >=2 batch blocks
        elif hw >= 256:
            t = max(128, _round_up(hw // 2, 128))         # -> >=2 spatial blocks
        # else: single tiny step; nothing useful to split.
    return b_blk, t


# ---------------------------------------------------------------------------
# Wrapper.
# ---------------------------------------------------------------------------
def out_conv(x_nchw, w_oihw, b):
    """x: (N, Cin, H, W); w: (Cout, Cin, 1, 1); b: (Cout,).  Returns (N, Cout, H, W)."""
    N, cin, H, W = x_nchw.shape
    cout = w_oihw.shape[0]
    hw = H * W
    dtype_bytes = jnp.dtype(x_nchw.dtype).itemsize

    x = x_nchw.reshape(N, cin, hw)               # contiguous -> free reshape
    w2 = w_oihw.reshape(cout, cin)
    b2 = b.reshape(cout, 1)

    budget = _vmem_budget_bytes()
    b_blk, t = _pick_tiles(N, hw, cin, cout, dtype_bytes, budget)
    grid = (pl.cdiv(N, b_blk), pl.cdiv(hw, t))

    # Scoped-VMEM limit: double-buffered, layout-padded in/out blocks plus the
    # resident weights/bias and headroom. Clamped under v7x's 64 MiB physical.
    sub = 8 if dtype_bytes >= 4 else 32 // dtype_bytes
    t_pad = _round_up(t, 128)
    in_blk = b_blk * _round_up(cin, sub) * t_pad * dtype_bytes
    out_blk = b_blk * _round_up(cout, sub) * t_pad * dtype_bytes
    w_bytes = _round_up(cout, sub) * _round_up(cin, 128) * dtype_bytes
    bias_bytes = _round_up(cout, sub) * 128 * dtype_bytes
    vmem_limit = 2 * (in_blk + out_blk) + w_bytes + bias_bytes + (4 << 20)
    vmem_limit = int(min(max(vmem_limit, 24 << 20), 48 << 20))

    y = pl.pallas_call(
        _conv1x1_kernel,
        out_shape=jax.ShapeDtypeStruct((N, cout, hw), x.dtype),
        grid=grid,
        in_specs=[
            pl.BlockSpec((b_blk, cin, t), lambda n, j: (n, 0, j)),
            pl.BlockSpec((cout, cin), lambda n, j: (0, 0)),   # resident weights
            pl.BlockSpec((cout, 1), lambda n, j: (0, 0)),     # resident bias
        ],
        out_specs=pl.BlockSpec((b_blk, cout, t), lambda n, j: (n, 0, j)),
        compiler_params=pltpu.CompilerParams(
            dimension_semantics=("parallel", "parallel"),
            vmem_limit_bytes=vmem_limit),
    )(x, w2, b2)

    return y.reshape(N, cout, H, W)


# ---------------------------------------------------------------------------
# Pure-JAX reference (independent path) for correctness checking.
# ---------------------------------------------------------------------------
def ref_out_conv(x_nchw, w_oihw, b):
    y = jax.lax.conv_general_dilated(
        x_nchw, w_oihw, (1, 1), "VALID",
        dimension_numbers=("NCHW", "OIHW", "NCHW"),
        precision=jax.lax.Precision.HIGHEST)
    return y + b[None, :, None, None]


if __name__ == "__main__":
    key = jax.random.PRNGKey(0)
    kx, kw, kb = jax.random.split(key, 3)

    # OutConv(in_channels=16, out_channels=8) on a (2, 16, 16, 16) NCHW input.
    N, cin, cout, H, W = 2, 16, 8, 16, 16
    x = jax.random.normal(kx, (N, cin, H, W), jnp.float32)
    w = 0.1 * jax.random.normal(kw, (cout, cin, 1, 1), jnp.float32)
    b = 0.1 * jax.random.normal(kb, (cout,), jnp.float32)

    out = jax.block_until_ready(jax.jit(out_conv)(x, w, b))
    ref = jax.block_until_ready(ref_out_conv(x, w, b))

    np.testing.assert_allclose(np.asarray(out), np.asarray(ref),
                               rtol=1e-4, atol=1e-4)
    assert out.shape == (N, cout, H, W)
    print("KERNEL_OK")
</pallas_src>

<mosaic_0001>
module attributes {stable_mosaic.version = 11 : i64} {
  func.func @_conv1x1_kernel(%arg0: i32, %arg1: i32, %arg2: memref<1x16x256xf32, #tpu.memory_space<vmem>>, %arg3: memref<8x16xf32, #tpu.memory_space<vmem>>, %arg4: memref<8x1xf32, #tpu.memory_space<vmem>>, %arg5: memref<1x8x256xf32, #tpu.memory_space<vmem>>) attributes {dimension_semantics = [#tpu.dimension_semantics<parallel>, #tpu.dimension_semantics<parallel>], iteration_bounds = array<i64: 2, 1>, scalar_prefetch = 0 : i64, scratch_operands = 0 : i64, tpu.core_type = #tpu.core_type<tc>, window_params = [{transform_indices = @transform_0, window_bounds = array<i64: 1, 16, 256>}, {pipeline_mode = #tpu.pipeline_mode<synchronous>, transform_indices = @transform_1, window_bounds = array<i64: 8, 16>}, {pipeline_mode = #tpu.pipeline_mode<synchronous>, transform_indices = @transform_2, window_bounds = array<i64: 8, 1>}, {transform_indices = @transform_3, window_bounds = array<i64: 1, 8, 256>}]} {
    %c0 = arith.constant 0 : index
    %c0_0 = arith.constant 0 : index
    %0 = vector.load %arg3[%c0, %c0_0] : memref<8x16xf32, #tpu.memory_space<vmem>>, vector<8x16xf32>
    %c0_1 = arith.constant 0 : index
    %c0_2 = arith.constant 0 : index
    %1 = vector.load %arg4[%c0_1, %c0_2] : memref<8x1xf32, #tpu.memory_space<vmem>>, vector<8x1xf32>
    %c0_3 = arith.constant 0 : index
    %c0_4 = arith.constant 0 : index
    %c0_5 = arith.constant 0 : index
    %2 = vector.load %arg2[%c0_3, %c0_4, %c0_5] : memref<1x16x256xf32, #tpu.memory_space<vmem>>, vector<1x16x256xf32>
    %3 = vector.shape_cast %2 : vector<1x16x256xf32> to vector<16x256xf32>
    %cst = arith.constant dense<0.000000e+00> : vector<8x256xf32>
    %4 = tpu.matmul %0, %3, %cst {dimension_numbers = #tpu.dot_dimension_numbers<[1], [0], [0], [1], [0, 0, 1, 1], [], []>, precision = #tpu.contract_precision<fp32>} : vector<8x16xf32>, vector<16x256xf32>, vector<8x256xf32> -> vector<8x256xf32>
    %5 = vector.broadcast %1 : vector<8x1xf32> to vector<8x256xf32>
    %6 = arith.addf %4, %5 : vector<8x256xf32>
    %c0_6 = arith.constant 0 : index
    %c0_7 = arith.constant 0 : index
    %c0_8 = arith.constant 0 : index
    %7 = vector.load %arg5[%c0_6, %c0_7, %c0_8] : memref<1x8x256xf32, #tpu.memory_space<vmem>>, vector<1x8x256xf32>
    %8 = vector.shape_cast %7 : vector<1x8x256xf32> to vector<8x256xf32>
    %9 = vector.shape_cast %6 : vector<8x256xf32> to vector<1x8x256xf32>
    tpu.vector_store %arg5[%c0_6, %c0_7, %c0_8], %9 {strides = array<i32>} : memref<1x8x256xf32, #tpu.memory_space<vmem>>, vector<1x8x256xf32>,
    return
  }
  func.func @transform_0(%arg0: i32, %arg1: i32) -> (i32, i32, i32) {
    %c0_i32 = arith.constant 0 : i32
    %c0_i32_0 = arith.constant 0 : i32
    return %arg0, %c0_i32, %arg1 : i32, i32, i32
  }
  func.func @transform_1(%arg0: i32, %arg1: i32) -> (i32, i32) {
    %c0_i32 = arith.constant 0 : i32
    %c0_i32_0 = arith.constant 0 : i32
    %c0_i32_1 = arith.constant 0 : i32
    return %c0_i32, %c0_i32_0 : i32, i32
  }
  func.func @transform_2(%arg0: i32, %arg1: i32) -> (i32, i32) {
    %c0_i32 = arith.constant 0 : i32
    %c0_i32_0 = arith.constant 0 : i32
    %c0_i32_1 = arith.constant 0 : i32
    return %c0_i32, %c0_i32_0 : i32, i32
  }
  func.func @transform_3(%arg0: i32, %arg1: i32) -> (i32, i32, i32) {
    %c0_i32 = arith.constant 0 : i32
    %c0_i32_0 = arith.constant 0 : i32
    return %arg0, %c0_i32, %arg1 : i32, i32, i32
  }
}

</mosaic_0001>

<bundles_post_ra>
// kernel: out_conv.1
= control target key start
LH: loop header
LB: loop body
LE: loop exit
PB: predicated region body
PF: predicated region fallthrough
CT: control target
= control target key end

     0   :  { %s927_s12 = smov 0   ;;  %s929_s13 = smov 0   ;;  %s976_s0 = inlined_call_operand.vmem [shape: f32[2,16,256], index: 0, kind: input, shape index: {}]   ;;  %s977_s1 = inlined_call_operand.vmem [shape: f32[8,16], index: 1, kind: input, shape index: {}]   ;;  %s978_s2 = inlined_call_operand.vmem [shape: f32[8,1], index: 2, kind: input, shape index: {}]   ;;  %s979_s3 = inlined_call_operand.vmem [shape: f32[2,8,256], index: 3, kind: output, shape index: {}]  }
   0x1   :  { %s931_s14 = smov 0  }
   0x2 LB: > { %s25_s15 = sadd.s32 1, %s899_s13  ;;  %p809_p0 = scmp.ge.s32.totalorder %s903_s14, 1  ;;  %s903_s14 = sphi %s931_s14, %s13_s14   ;;  %s899_s13 = sphi %s929_s13, %s981_s13   ;;  %s895_s12 = sphi %s927_s12, %s980_s12  }
   0x3   : > { %p27_p1 = scmp.ge.s32.totalorder %s25_s15, 2  ;;  %p158_p2 = scmp.lt.s32.totalorder %s903_s14, 3 }
   0x5   : > { %s983_s15 = smov (%p27_p1, %s25_s15), 0  ;;  %p159_p3 = pnand %p809_p0, %p158_p2 }
   0x6   : > { %p191_p4 = scmp.lt.s32.totalorder (!%p159_p3), %s895_s12, 1  ;;  %v210_v0 = vld [vmem:[%s977_s1] sm:$0xff] (!%p159_p3)  ;;  %vm221_vm0 = vcmask (!%p159_p3), 130048   ;;  %v905_v2 = vmov (!%p159_p3), 0.0   ;;  %v906_v5 = vmov (!%p159_p3), 0  }
   0x7   : > { %162 = sbr.rel (%p159_p3) target bundleno = 260 (0x104), region = 32  ;;  %v211_v1 = vld [vmem:[%s978_s2] sm:$0xff] (!%p159_p3)  ;;  %293 = vmatprep.mubr.f32.mxu1 (!%p159_p3), %v905_v2  ;;  %546 = vmatprep.mubr.f32.mxu0 (!%p159_p3), %v905_v2  ;;  %v223_v3 = vsel (!%p159_p3), %vm221_vm0, %v210_v0, 0 }
   0x8   : > { %v294_v4 = vand.u32 (!%p159_p3), 4294901760, %v223_v3  ;;  %880 = vset.pattern.permute.xlu0 (!%p159_p3), %v906_v5 }
   0x9   : > { %218 = vperm.xlu0 (!%p159_p3), %880, %v211_v1  }
   0xa   : > { %v295_v6 = vsub.f32 (!%p159_p3), %v223_v3, %v294_v4 }
   0xc   : > { %v296_v10 = vand.u32 (!%p159_p3), 4294901760, %v295_v6 }
   0xe   : > { %s985_s12 = smov (!%p191_p4, %s895_s12), 1  ;;  %v297_v16 = vsub.f32 %v295_v6, %v296_v10 }
   0xf   : > { %s816_s20 = sshll.u32 %s985_s12, 5  ;;  %s817_s24 = sshll.u32 %s985_s12, 4 }
  0x10   : > { %s198_s23 = scalar_lea.vmem %s976_s0, %s816_s20  ;;  %v298_v23 = vand.u32 4294901760, %v297_v16  ;;  %s208_s27 = scalar_lea.vmem %s979_s3, %s817_s24 }
  0x11   : > { %v213_v7 = vld [vmem:[%s198_s23 + $0x8] sm:$0xff]  ;;  %v215_v8 = vld [vmem:[%s198_s23 + $0x18] sm:$0xff]  ;;  %v212_v9 = vld [vmem:[%s198_s23] sm:$0xff] }
  0x12   : > { %v225_v11 = vand.u32 4294901760, %v213_v7  ;;  %v229_v12 = vand.u32 4294901760, %v215_v8  ;;  %v214_v13 = vld [vmem:[%s198_s23 + $0x10] sm:$0xff]  ;;  %v227_v14 = vand.u32 4294901760, %v212_v9 }
  0x13   : > { %v231_v15 = vand.u32 4294901760, %v214_v13 }
  0x14   : > { %v818_v17 = vpack.c.bf16 %v229_v12, %v225_v11  ;;  %v306_v18 = vsub.f32 %v213_v7, %v225_v11  ;;  %v318_v19 = vsub.f32 %v215_v8, %v229_v12  ;;  %v312_v20 = vsub.f32 %v212_v9, %v227_v14 }
  0x15   : > { %v820_v21 = vpack.c.bf16 %v231_v15, %v227_v14  ;;  %v324_v22 = vsub.f32 %v214_v13, %v231_v15 }
  0x16   : > { %819 = vmatprep.subr.bf16.mxu1 %v818_v17  ;;  %831 = vmatprep.subr.bf16.mxu0 %v818_v17  ;;  %v307_v24 = vand.u32 4294901760, %v306_v18  ;;  %v319_v25 = vand.u32 4294901760, %v318_v19  ;;  %v313_v26 = vand.u32 4294901760, %v312_v20  ;;  %v826_v39 = vpack.c.bf16 %v318_v19, %v306_v18 }
  0x17   : > { %821 = vmatpush1.bf16.msra.mxu1 %v820_v21  ;;  %833 = vmatpush1.bf16.msra.mxu0 %v820_v21  ;;  %v325_v27 = vand.u32 4294901760, %v324_v22  ;;  %v828_v41 = vpack.c.bf16 %v324_v22, %v312_v20 }
  0x18   : > { %v308_v28 = vsub.f32 %v306_v18, %v307_v24  ;;  %v320_v29 = vsub.f32 %v318_v19, %v319_v25  ;;  %v834_v30 = vpack.c.bf16 %v319_v25, %v307_v24  ;;  %v314_v31 = vsub.f32 %v312_v20, %v313_v26 }
  0x19   : > { %v326_v32 = vsub.f32 %v324_v22, %v325_v27  ;;  %v836_v33 = vpack.c.bf16 %v325_v27, %v313_v26 }
  0x1a   : > { %299 = vmatmul.mubr.f32.vlgmr.msra.gmra.mrb[0].mxu1 %v298_v23  ;;  %550 = vmatmul.mubr.f32.vlgmr.msra.gmra.mrb[0].mxu0 %v296_v10  ;;  %v309_v34 = vand.u32 4294901760, %v308_v28  ;;  %v321_v35 = vand.u32 4294901760, %v320_v29  ;;  %v315_v36 = vand.u32 4294901760, %v314_v31 }
  0x1b   : > { %835 = vmatprep.subr.bf16.mxu0 %v834_v30  ;;  %v327_v37 = vand.u32 4294901760, %v326_v32  ;;  %389 = vmatprep.mubr.f32.mxu1 %v905_v2 }
  0x1c   : > { %v822_v38 = vpack.c.bf16 %v321_v35, %v309_v34  ;;  %837 = vmatpush1.bf16.msra.mxu0 %v836_v33  ;;  %632 = vmatprep.mubr.f32.mxu0 %v905_v2 }
  0x1d   : > { %v824_v40 = vpack.c.bf16 %v327_v37, %v315_v36  ;;  %839 = vmatprep.subr.bf16.mxu0 %v818_v17 }
  0x1e   : > { %823 = vmatprep.subr.bf16.mxu1 %v822_v38 }
  0x1f   : > { %825 = vmatpush1.bf16.msra.mxu1 %v824_v40 }
  0x20   : > { %827 = vmatprep.subr.bf16.mxu1 %v826_v39 }
  0x22   : > { %391 = vmatmul.mubr.f32.vlgmr.msra.gmra.mrb[0].mxu1 %v294_v4  ;;  %634 = vmatmul.mubr.f32.vlgmr.msra.gmra.mrb[0].mxu0 %v294_v4 }
  0x23   : > { %829 = vmatpush1.bf16.msra.mxu1 %v828_v41  ;;  %841 = vmatpush1.bf16.msra.mxu0 %v820_v21 }
  0x24   : > { %469 = vmatprep.mubr.f32.mxu1 %v905_v2  ;;  %708 = vmatprep.mubr.f32.mxu0 %v905_v2 }
  0x2a   : > { %472 = vmatmul.mubr.f32.vlgmr.msra.gmra.mrb[0].mxu1 %v295_v6  ;;  %710 = vmatmul.mubr.f32.vlgmr.msra.gmra.mrb[0].mxu0 %v294_v4 }
  0x88   : > { %v219_v42 = vpop.permute.xlu0 %218 }
  0xfd   : > { %v473_v43 = vpop.f32.mrb[0].mxu1  ;;  %v711_v44 = vpop.f32.mrb[0].mxu0 }
  0xfe   : > { %v842_v45 = vadd.f32 %v473_v43, %v219_v42  ;;  %v475_v46 = vpop.f32.mrb[1].mxu1  ;;  %v713_v47 = vpop.f32.mrb[1].mxu0 }
  0xff   : > { %v844_v48 = vadd.f32 %v475_v46, %v219_v42 }
 0x100   : > { %v843_v49 = vadd.f32 %v842_v45, %v711_v44 }
 0x101   : > { %v845_v50 = vadd.f32 %v844_v48, %v713_v47 }
 0x102   : > { %716 = vst [vmem:[%s208_s27] sm:$0xff] %v843_v49 }
 0x103   : > { %717 = vst [vmem:[%s208_s27 + $0x8] sm:$0xff] %v845_v50 }
 0x104 PF: > { %s13_s14 = sadd.s32 1, %s903_s14   ;;  %s980_s12 = smov %s899_s13 }
 0x105   : > { %p10_p5 = scmp.ge.s32.totalorder %s13_s14, 4   ;;  %s981_s13 = smov %s983_s15 }
 0x107   :  { %12 = sbr.rel (!%p10_p5) target bundleno = 2 (0x2), region = 62 }

</bundles_post_ra>
